<compile_context>
chip_gen: v7x
topology: tpu7x:2x2x1
jax: 0.10.0
libtpu: 0.0.40
codegen_flags: <defaults>
</compile_context>

<pallas_src>
import functools

import jax
import jax.numpy as jnp
from jax.experimental import pallas as pl
from jax.experimental.pallas import tpu as pltpu

SMOOTH_L1_THRESHOLD = 0.1   # default threshold of SmoothL1Dis
_LANES = 128
_MAX_TILE_ROWS = 2048       # 2048 x 128 x f32 = 1 MiB per input tile


def _cdiv(a, b):
    return -(-a // b)


def _round_up(x, m):
    return _cdiv(x, m) * m


# -----------------------------------------------------------------------------
# Kernel: streaming reduction of gamma2*MSE-terms + gamma1*SmoothL1-terms.
# grid = (num_shards, steps):  shard axis "parallel" (megacore), step axis
# "arbitrary" (carries the per-shard accumulator scratch).
# -----------------------------------------------------------------------------
def _point_loss_kernel(pts_ref, pts_gt_ref, qo_ref, qo_gt_ref, out_ref, acc_ref,
                       *, rows, rows_tile, num_shards, w_feat, w_qo, needs_mask):
    c = pl.program_id(0)            # shard (one per TensorCore on v7x)
    i = pl.program_id(1)            # streaming step within the shard
    steps = pl.num_programs(1)

    @pl.when(i == 0)
    def _():
        acc_ref[...] = jnp.zeros_like(acc_ref)

    # Pure VPU work; inputs may be bf16 — upcast here, accumulate in f32.
    d = pts_ref[...].astype(jnp.float32) - pts_gt_ref[...].astype(jnp.float32)
    diff = jnp.abs(qo_ref[...].astype(jnp.float32) - qo_gt_ref[...].astype(jnp.float32))
    less = diff * diff * (1.0 / (2.0 * SMOOTH_L1_THRESHOLD))
    higher = diff - SMOOTH_L1_THRESHOLD / 2.0
    sl1 = jnp.where(diff > SMOOTH_L1_THRESHOLD, higher, less)

    # Single merged, gamma-weighted accumulator (suggestion: one scratch, one reduce).
    contrib = w_feat * (d * d) + w_qo * sl1

    if needs_mask:
        # Intended (unclamped) global row offset of this tile.  Rows beyond the real
        # array (partial last block, or a fully-clamped duplicate block) are zeroed,
        # so garbage VMEM contents never reach the accumulator.
        tile_start = (i * num_shards + c) * rows_tile
        row_ids = jax.lax.broadcasted_iota(jnp.int32, contrib.shape, 0) + tile_start
        contrib = jnp.where(row_ids < rows, contrib, 0.0)

    acc_ref[...] += contrib

    @pl.when(i == steps - 1)
    def _():
        shard_sum = jnp.sum(acc_ref[...])           # one cross-lane reduce per shard
        out_ref[...] = jnp.broadcast_to(shard_sum, out_ref.shape)


def _lane_dense(x, total):
    """(B, N, 3) -> lane-dense (rows, 128).  Free reshape when total % 128 == 0."""
    flat = x.reshape(-1)
    if total % _LANES != 0:
        # TODO(synk): rare ragged-tail path still performs one padding copy; the common
        # power-of-two point-cloud sizes take the copy-free reshape path above.
        flat = jnp.pad(flat, (0, _round_up(total, _LANES) - total))
    return flat.reshape(-1, _LANES)


def _pose_dis(r1, t1, s1, r2, t2, s2):
    # Tiny O(B*15)-float op; kept in plain JAX per the perf review so the kernel is a
    # pure streaming reduction (removes 10 tiny (8,128)-padded VMEM inputs + DMAs).
    dis_r = jnp.mean(jnp.linalg.norm((r1 - r2).astype(jnp.float32), axis=1))
    dis_t = jnp.mean(jnp.linalg.norm((t1 - t2).astype(jnp.float32), axis=1))
    dis_s = jnp.mean(jnp.linalg.norm((s1 - s2).astype(jnp.float32), axis=1))
    return dis_r + dis_t + dis_s


# -----------------------------------------------------------------------------
# Wrapper == SupervisedLoss.forward
# -----------------------------------------------------------------------------
def supervised_loss(end_points, *, gamma1=8.0, gamma2=8.0,
                    freeze_world_enhancer=False):
    pts = end_points['pts_w_local']
    pts_gt = end_points['pts_w_local_gt']
    qo = end_points['pred_qo']
    qo_gt = end_points['qo']
    B, N, C = pts.shape
    total = B * N * C
    rows = _cdiv(total, _LANES)

    # ---- Row tiling / megacore sharding ------------------------------------
    if rows < 16:
        num_shards = 1
        rows_tile = rows                 # single full-array block (equals full dims)
    else:
        num_shards = 2                   # v7x: one shard per TensorCore
        rows_tile = min(_MAX_TILE_ROWS, _round_up(_cdiv(rows, num_shards), 8))
    blocks_total = _cdiv(rows, rows_tile)
    steps = _cdiv(blocks_total, num_shards)
    needs_mask = (num_shards * steps * rows_tile) != rows

    pts_f = _lane_dense(pts, total)
    pts_gt_f = _lane_dense(pts_gt, total)
    qo_f = _lane_dense(qo, total)
    qo_gt_f = _lane_dense(qo_gt, total)

    def point_index(c, i):
        # Round-robin blocks over shards; clamp so no DMA starts past the array.
        # (A fully-clamped duplicate block contributes 0 via the in-kernel row mask.)
        return (jnp.minimum(i * num_shards + c, blocks_total - 1), 0)

    point_spec = pl.BlockSpec((rows_tile, _LANES), point_index)

    kernel = functools.partial(
        _point_loss_kernel,
        rows=rows, rows_tile=rows_tile, num_shards=num_shards,
        w_feat=float(gamma2) / float(B * N * C),   # gamma2 * MSE  (mean over all elems)
        w_qo=float(gamma1) / float(B * N),         # gamma1 * mean_{b,n}(sum_xyz smooth_l1)
        needs_mask=needs_mask,
    )

    partials = pl.pallas_call(
        kernel,
        out_shape=jax.ShapeDtypeStruct((num_shards, 8, _LANES), jnp.float32),
        grid=(num_shards, steps),
        in_specs=[point_spec, point_spec, point_spec, point_spec],
        out_specs=pl.BlockSpec((1, 8, _LANES), lambda c, i: (c, 0, 0)),
        scratch_shapes=[pltpu.VMEM((rows_tile, _LANES), jnp.float32)],
        compiler_params=pltpu.CompilerParams(
            dimension_semantics=("parallel", "arbitrary"),
            vmem_limit_bytes=32 * 1024 * 1024),
    )(pts_f, pts_gt_f, qo_f, qo_gt_f)

    # gamma1 * loss_qo + gamma2 * loss_feat (combined across shards).
    point_losses = jnp.sum(partials[:, 0, 0])

    r_gt = end_points['rotation_label']
    t_gt = end_points['translation_label']
    s_gt = end_points['size_label']
    loss = (_pose_dis(end_points['pred_rotation'], end_points['pred_translation'],
                      end_points['pred_size'], r_gt, t_gt, s_gt)
            + _pose_dis(end_points['pred_rotation_aux_cam'],
                        end_points['pred_translation_aux_cam'],
                        end_points['pred_size_aux_cam'], r_gt, t_gt, s_gt)
            + point_losses)
    if not freeze_world_enhancer:
        loss = loss + _pose_dis(end_points['pred_rotation_aux_world'],
                                end_points['pred_translation_aux_world'],
                                end_points['pred_size_aux_world'], r_gt, t_gt, s_gt)
    return loss


# -----------------------------------------------------------------------------
# Pure-JAX reference (mirror of the PyTorch code) for the correctness check.
# -----------------------------------------------------------------------------
def _reference_loss(ep, *, gamma1, gamma2, freeze_world_enhancer):
    def smooth_l1_dis(p1, p2, t=SMOOTH_L1_THRESHOLD):
        diff = jnp.abs(p1 - p2)
        less = diff ** 2 / (2.0 * t)
        higher = diff - t / 2.0
        dis = jnp.where(diff > t, higher, less)
        return jnp.mean(jnp.sum(dis, axis=2))

    def pose_dis(r1, t1, s1, r2, t2, s2):
        dr = jnp.mean(jnp.linalg.norm(r1 - r2, axis=1))
        dt = jnp.mean(jnp.linalg.norm(t1 - t2, axis=1))
        ds = jnp.mean(jnp.linalg.norm(s1 - s2, axis=1))
        return dr + dt + ds

    loss_feat = jnp.mean((ep['pts_w_local'] - ep['pts_w_local_gt']) ** 2)
    loss_qo = smooth_l1_dis(ep['pred_qo'], ep['qo'])
    loss = (pose_dis(ep['pred_rotation'], ep['pred_translation'], ep['pred_size'],
                     ep['rotation_label'], ep['translation_label'], ep['size_label'])
            + pose_dis(ep['pred_rotation_aux_cam'], ep['pred_translation_aux_cam'],
                       ep['pred_size_aux_cam'],
                       ep['rotation_label'], ep['translation_label'], ep['size_label'])
            + gamma1 * loss_qo + gamma2 * loss_feat)
    if not freeze_world_enhancer:
        loss = loss + pose_dis(ep['pred_rotation_aux_world'],
                               ep['pred_translation_aux_world'],
                               ep['pred_size_aux_world'],
                               ep['rotation_label'], ep['translation_label'],
                               ep['size_label'])
    return loss


if __name__ == "__main__":
    B, N = 2, 1024   # rows = B*N*3/128 = 48 -> exercises the 2-shard, pad-free path
    key = jax.random.PRNGKey(0)
    names_shapes = {
        'pred_qo': (B, N, 3),
        'qo': (B, N, 3),
        'pts_w_local': (B, N, 3),
        'pts_w_local_gt': (B, N, 3),
        'pred_rotation': (B, 3, 3),
        'pred_translation': (B, 3),
        'pred_size': (B, 3),
        'pred_rotation_aux_cam': (B, 3, 3),
        'pred_translation_aux_cam': (B, 3),
        'pred_size_aux_cam': (B, 3),
        'pred_rotation_aux_world': (B, 3, 3),
        'pred_translation_aux_world': (B, 3),
        'pred_size_aux_world': (B, 3),
        'rotation_label': (B, 3, 3),
        'translation_label': (B, 3),
        'size_label': (B, 3),
    }
    end_points = {}
    for name, shape in names_shapes.items():
        key, sub = jax.random.split(key)
        end_points[name] = jax.random.normal(sub, shape, dtype=jnp.float32)

    gamma1, gamma2 = 8.0, 8.0            # cfg.loss.gamma1 / gamma2 (deterministic)
    freeze_world_enhancer = False        # cfg.freeze_world_enhancer

    loss = supervised_loss(end_points, gamma1=gamma1, gamma2=gamma2,
                           freeze_world_enhancer=freeze_world_enhancer)
    loss = jax.block_until_ready(loss)

    ref = _reference_loss(end_points, gamma1=gamma1, gamma2=gamma2,
                          freeze_world_enhancer=freeze_world_enhancer)
    ref = jax.block_until_ready(ref)

    if not jnp.allclose(loss, ref, rtol=1e-4, atol=1e-4):
        raise AssertionError(f"kernel loss {loss} != reference {ref}")
    print("KERNEL_OK")
</pallas_src>

<mosaic_0001>
module attributes {stable_mosaic.version = 11 : i64} {
  func.func @_point_loss_kernel(%arg0: i32, %arg1: i32, %arg2: memref<24x128xf32, #tpu.memory_space<vmem>>, %arg3: memref<24x128xf32, #tpu.memory_space<vmem>>, %arg4: memref<24x128xf32, #tpu.memory_space<vmem>>, %arg5: memref<24x128xf32, #tpu.memory_space<vmem>>, %arg6: memref<1x8x128xf32, #tpu.memory_space<vmem>>, %arg7: memref<24x128xf32, #tpu.memory_space<vmem>>) attributes {dimension_semantics = [#tpu.dimension_semantics<parallel>, #tpu.dimension_semantics<arbitrary>], iteration_bounds = array<i64: 2, 1>, scalar_prefetch = 0 : i64, scratch_operands = 1 : i64, tpu.core_type = #tpu.core_type<tc>, window_params = [{transform_indices = @transform_0, window_bounds = array<i64: 24, 128>}, {transform_indices = @transform_1, window_bounds = array<i64: 24, 128>}, {transform_indices = @transform_2, window_bounds = array<i64: 24, 128>}, {transform_indices = @transform_3, window_bounds = array<i64: 24, 128>}, {transform_indices = @transform_4, window_bounds = array<i64: 1, 8, 128>}]} {
    %c0_i32 = arith.constant 0 : i32
    %0 = arith.cmpi eq, %arg1, %c0_i32 : i32
    %1 = arith.extui %0 : i1 to i32
    %c0_i32_0 = arith.constant 0 : i32
    %2 = arith.cmpi ne, %1, %c0_i32_0 : i32
    scf.if %2 {
      %cst_18 = arith.constant 0.000000e+00 : f32
      %30 = vector.broadcast %cst_18 : f32 to vector<24x128xf32>
      %c0_19 = arith.constant 0 : index
      %c0_20 = arith.constant 0 : index
      %31 = vector.load %arg7[%c0_19, %c0_20] : memref<24x128xf32, #tpu.memory_space<vmem>>, vector<24x128xf32>
      tpu.vector_store %arg7[%c0_19, %c0_20], %30 {strides = array<i32>} : memref<24x128xf32, #tpu.memory_space<vmem>>, vector<24x128xf32>,
    } else {
    }
    %c0 = arith.constant 0 : index
    %c0_1 = arith.constant 0 : index
    %3 = vector.load %arg2[%c0, %c0_1] : memref<24x128xf32, #tpu.memory_space<vmem>>, vector<24x128xf32>
    %c0_2 = arith.constant 0 : index
    %c0_3 = arith.constant 0 : index
    %4 = vector.load %arg3[%c0_2, %c0_3] : memref<24x128xf32, #tpu.memory_space<vmem>>, vector<24x128xf32>
    %5 = arith.subf %3, %4 : vector<24x128xf32>
    %c0_4 = arith.constant 0 : index
    %c0_5 = arith.constant 0 : index
    %6 = vector.load %arg4[%c0_4, %c0_5] : memref<24x128xf32, #tpu.memory_space<vmem>>, vector<24x128xf32>
    %c0_6 = arith.constant 0 : index
    %c0_7 = arith.constant 0 : index
    %7 = vector.load %arg5[%c0_6, %c0_7] : memref<24x128xf32, #tpu.memory_space<vmem>>, vector<24x128xf32>
    %8 = arith.subf %6, %7 : vector<24x128xf32>
    %9 = math.absf %8 : vector<24x128xf32>
    %10 = arith.mulf %9, %9 : vector<24x128xf32>
    %cst = arith.constant 5.000000e+00 : f32
    %11 = vector.broadcast %cst : f32 to vector<24x128xf32>
    %12 = arith.mulf %10, %11 : vector<24x128xf32>
    %cst_8 = arith.constant 5.000000e-02 : f32
    %13 = vector.broadcast %cst_8 : f32 to vector<24x128xf32>
    %14 = arith.subf %9, %13 : vector<24x128xf32>
    %cst_9 = arith.constant 1.000000e-01 : f32
    %15 = vector.broadcast %cst_9 : f32 to vector<24x128xf32>
    %16 = arith.cmpf ogt, %9, %15 : vector<24x128xf32>
    %17 = arith.select %16, %14, %12 : vector<24x128xi1>, vector<24x128xf32>
    %18 = arith.mulf %5, %5 : vector<24x128xf32>
    %cst_10 = arith.constant 0.00130208337 : f32
    %19 = vector.broadcast %cst_10 : f32 to vector<24x128xf32>
    %20 = arith.mulf %19, %18 : vector<24x128xf32>
    %cst_11 = arith.constant 3.906250e-03 : f32
    %21 = vector.broadcast %cst_11 : f32 to vector<24x128xf32>
    %22 = arith.mulf %21, %17 : vector<24x128xf32>
    %23 = arith.addf %20, %22 : vector<24x128xf32>
    %c0_12 = arith.constant 0 : index
    %c0_13 = arith.constant 0 : index
    %24 = vector.load %arg7[%c0_12, %c0_13] : memref<24x128xf32, #tpu.memory_space<vmem>>, vector<24x128xf32>
    %25 = arith.addf %24, %23 : vector<24x128xf32>
    %c0_14 = arith.constant 0 : index
    %c0_15 = arith.constant 0 : index
    %26 = vector.load %arg7[%c0_14, %c0_15] : memref<24x128xf32, #tpu.memory_space<vmem>>, vector<24x128xf32>
    tpu.vector_store %arg7[%c0_14, %c0_15], %25 {strides = array<i32>} : memref<24x128xf32, #tpu.memory_space<vmem>>, vector<24x128xf32>,
    %c0_i32_16 = arith.constant 0 : i32
    %27 = arith.cmpi eq, %arg1, %c0_i32_16 : i32
    %28 = arith.extui %27 : i1 to i32
    %c0_i32_17 = arith.constant 0 : i32
    %29 = arith.cmpi ne, %28, %c0_i32_17 : i32
    scf.if %29 {
      %c0_18 = arith.constant 0 : index
      %c0_19 = arith.constant 0 : index
      %30 = vector.load %arg7[%c0_18, %c0_19] : memref<24x128xf32, #tpu.memory_space<vmem>>, vector<24x128xf32>
      %31 = vector.shape_cast %30 : vector<24x128xf32> to vector<1x24x128xf32>
      %cst_20 = arith.constant dense<0.000000e+00> : vector<1xf32>
      %32 = vector.multi_reduction <add>, %31, %cst_20 [1, 2] : vector<1x24x128xf32> to vector<1xf32>
      %33 = vector.shape_cast %32 : vector<1xf32> to vector<1x1x1xf32>
      %34 = vector.extract %33[0, 0, 0] : f32 from vector<1x1x1xf32>
      %35 = vector.broadcast %34 : f32 to vector<1x8x128xf32>
      %c0_21 = arith.constant 0 : index
      %c0_22 = arith.constant 0 : index
      %c0_23 = arith.constant 0 : index
      %36 = vector.load %arg6[%c0_21, %c0_22, %c0_23] : memref<1x8x128xf32, #tpu.memory_space<vmem>>, vector<1x8x128xf32>
      tpu.vector_store %arg6[%c0_21, %c0_22, %c0_23], %35 {strides = array<i32>} : memref<1x8x128xf32, #tpu.memory_space<vmem>>, vector<1x8x128xf32>,
    } else {
    }
    return
  }
  func.func @transform_0(%arg0: i32, %arg1: i32) -> (i32, i32) {
    %c2_i32 = arith.constant 2 : i32
    %0 = arith.muli %arg1, %c2_i32 : i32
    %1 = arith.addi %0, %arg0 : i32
    %c1_i32 = arith.constant 1 : i32
    %2 = arith.minsi %1, %c1_i32 : i32
    %c0_i32 = arith.constant 0 : i32
    %c0_i32_0 = arith.constant 0 : i32
    return %2, %c0_i32 : i32, i32
  }
  func.func @transform_1(%arg0: i32, %arg1: i32) -> (i32, i32) {
    %c2_i32 = arith.constant 2 : i32
    %0 = arith.muli %arg1, %c2_i32 : i32
    %1 = arith.addi %0, %arg0 : i32
    %c1_i32 = arith.constant 1 : i32
    %2 = arith.minsi %1, %c1_i32 : i32
    %c0_i32 = arith.constant 0 : i32
    %c0_i32_0 = arith.constant 0 : i32
    return %2, %c0_i32 : i32, i32
  }
  func.func @transform_2(%arg0: i32, %arg1: i32) -> (i32, i32) {
    %c2_i32 = arith.constant 2 : i32
    %0 = arith.muli %arg1, %c2_i32 : i32
    %1 = arith.addi %0, %arg0 : i32
    %c1_i32 = arith.constant 1 : i32
    %2 = arith.minsi %1, %c1_i32 : i32
    %c0_i32 = arith.constant 0 : i32
    %c0_i32_0 = arith.constant 0 : i32
    return %2, %c0_i32 : i32, i32
  }
  func.func @transform_3(%arg0: i32, %arg1: i32) -> (i32, i32) {
    %c2_i32 = arith.constant 2 : i32
    %0 = arith.muli %arg1, %c2_i32 : i32
    %1 = arith.addi %0, %arg0 : i32
    %c1_i32 = arith.constant 1 : i32
    %2 = arith.minsi %1, %c1_i32 : i32
    %c0_i32 = arith.constant 0 : i32
    %c0_i32_0 = arith.constant 0 : i32
    return %2, %c0_i32 : i32, i32
  }
  func.func @transform_4(%arg0: i32, %arg1: i32) -> (i32, i32, i32) {
    %c0_i32 = arith.constant 0 : i32
    %c0_i32_0 = arith.constant 0 : i32
    %c0_i32_1 = arith.constant 0 : i32
    return %arg0, %c0_i32, %c0_i32_0 : i32, i32, i32
  }
}

</mosaic_0001>

<bundles_post_ra>
// kernel: tpu_custom_call.1
= control target key start
LH: loop header
LB: loop body
LE: loop exit
PB: predicated region body
PF: predicated region fallthrough
CT: control target
= control target key end

     0   :  { %s1394_s0 = inlined_call_operand.hbm [shape: f32[48,128], index: 0, kind: input, shape index: {}]   ;;  %s1395_s1 = inlined_call_operand.hbm [shape: f32[48,128], index: 1, kind: input, shape index: {}]   ;;  %s1396_s2 = inlined_call_operand.hbm [shape: f32[48,128], index: 2, kind: input, shape index: {}]   ;;  %s1397_s3 = inlined_call_operand.hbm [shape: f32[48,128], index: 3, kind: input, shape index: {}]   ;;  %s1398_s4 = inlined_call_operand.hbm [shape: f32[2,8,128], index: 4, kind: output, shape index: {}]  }
   0x1   :  { %1409 = sst [smem:[#allocation22_spill]] %s1394_s0 }
   0x2   :  { %1410 = sst [smem:[#allocation23_spill]] %s1395_s1 }
   0x3   :  { %9 = vsyncpa [#allocation4], 0 }
   0x4   :  { %11 = vsyncpa [#allocation4 + $0x1], 0 }
   0x5   :  { %12 = vsyncpa [#allocation7], 0 }
   0x6   :  { %14 = vsyncpa [#allocation7 + $0x1], 0 }
   0x7   :  { %15 = vsyncpa [#allocation10], 0 }
   0x8   :  { %17 = vsyncpa [#allocation10 + $0x1], 0 }
   0x9   :  { %18 = vsyncpa [#allocation5], 0 }
   0xa   :  { %20 = vsyncpa [#allocation5 + $0x1], 0  ;;  %s1053_s15 = smov 0   ;;  %s1055_s16 = smov 0  }
   0xb   :  { %s1057_s17 = smov 0   ;;  %s1059_s18 = smov 0  }
   0xc   :  { %s1061_s19 = smov 0   ;;  %s1063_s20 = smov 0  }
   0xd   :  { %s1065_s21 = smov 0   ;;  %s1067_s22 = smov 0  }
   0xe   :  { %s1069_s23 = smov 0  }
   0xf LB: > { %1411 = sst [smem:[#allocation16_spill]] %s995_s17  ;;  %s1097_s24 = sadd.s32 4294967295, %s1019_s23   ;;  %s1019_s23 = sphi %s1069_s23, %s26_s23   ;;  %s1015_s22 = sphi %s1067_s22, %s1439_s22   ;;  %s1011_s21 = sphi %s1065_s21, %s1438_s21   ;;  %s1007_s20 = sphi %s1063_s20, %s1437_s20   ;;  %s1003_s19 = sphi %s1061_s19, %s1443_s19   ;;  %s999_s18 = sphi %s1059_s18, %s1442_s18   ;;  %s995_s17 = sphi %s1057_s17, %s1435_s17   ;;  %s991_s16 = sphi %s1055_s16, %s1441_s16   ;;  %s987_s15 = sphi %s1053_s15, %s1440_s15  }
  0x10   : > { %1412 = sst [smem:[#allocation17_spill]] %s1007_s20  ;;  %s655_s25 = sadd.s32 4294967294, %s1019_s23  }
  0x11   : > { %1413 = sst [smem:[#allocation18_spill]] %s1015_s22  ;;  %s38_s26 = sadd.s32 1, %s1015_s22 }
  0x12   : > { %p44_p0 = scmp.lt.s32.totalorder %s1015_s22, 1  ;;  %p40_p1 = scmp.ge.s32.totalorder %s38_s26, 2 }
  0x13   : > { %s53_s27 = sadd.s32 1, %s1007_s20  ;;  %p60_p2 = scmp.ne.s32.totalorder %s1007_s20, %s1003_s19 }
  0x14   : > { %s45_s28 = scalar_select %p44_p0, %s1015_s22, 1 }
  0x15   : > { %s1445_s26 = smov (%p40_p1, %s38_s26), 0  ;;  %p61_p3 = scmp.eq.s32.totalorder %s1019_s23, 0 }
  0x16   : > { %1414 = sst [smem:[#allocation19_spill]] %s1445_s26  ;;  %p48_p4 = scmp.lt.s32.totalorder %s1445_s26, 1 }
  0x17   : > { %p66_p5 = scmp.ne.s32.totalorder %s1003_s19, %s999_s18  ;;  %p1111_p6 = por %p61_p3, %p60_p2 }
  0x18   : > { %p67_p7 = scmp.eq.s32.totalorder %s1097_s24, 0  ;;  %s178_s6 = ssub.s32 %s1015_s22, %s1445_s26 }
  0x19   : > { %s49_s30 = scalar_select %p48_p4, %s1445_s26, 1 }
  0x1a   : > { %p1117_p8 = por %p67_p7, %p66_p5  ;;  %p179_p9 = scmp.eq.s32.totalorder %s178_s6, 0 }
  0x1b   : > { %s50_s7 = ssub.s32 %s45_s28, %s49_s30  ;;  %s181_s8 = sadd.s32 1, %s995_s17 }
  0x1c   : > { %s1416_s5 = scalar_select %p1117_p8, 1, 0 }
  0x1d   : > { %p51_p10 = scmp.eq.s32.totalorder %s50_s7, 0  ;;  %p191_p11 = scmp.ne.s32.totalorder %s995_s17, %s991_s16 }
  0x1e   : > { %s1125_s9 = scalar_select %p179_p9, %s995_s17, %s181_s8  }
  0x1f   : > { %s1128_s10 = scalar_select %p51_p10, %s1007_s20, %s53_s27  }
  0x20   : > { %1417 = sst [smem:[#allocation20_spill]] %s1125_s9  ;;  %p192_p12 = scmp.eq.s32.totalorder %s1097_s24, 1 }
  0x21   : > { %1418 = sst [smem:[#allocation21_spill]] %s1128_s10  ;;  %p197_p13 = scmp.ne.s32.totalorder %s991_s16, %s987_s15 }
  0x22   : > { %p198_p0 = scmp.eq.s32.totalorder %s655_s25, 1  ;;  %p1135_p1 = por %p192_p12, %p191_p11 }
  0x23   : > { %p709_p4 = scmp.lt.s32.totalorder %s1019_s23, 2  ;;  %s1146_s13 = sand.u32 1, %s1007_s20  }
  0x24   : > { %s1419_s11 = scalar_select %p1135_p1, 1, 0 }
  0x25   : > { %p1140_p3 = por %p198_p0, %p197_p13  ;;  %s1148_s14 = smul.u32 384, %s45_s28 }
  0x26   : > { %s1151_s18 = smul.u32 24, %s1146_s13  ;;  %p1155_p5 = pnand %p709_p4, %p1111_p6 }
  0x27   : > { %s1420_s12 = scalar_select %p1140_p3, 1, 0 }
  0x28   : > { %s243_s27 = sand.u32 1, %s1019_s23   ;;  %s1422_s1 = sld [smem:[#allocation23_spill]] }
  0x29   : > { %s247_s28 = scalar_lea.vmem [#allocation6], %s1151_s18  ;;  %s1170_s29 = scalar_lea.sflag [#allocation7], %s243_s27 }
  0x2a   : > { %s258_s8 = sshll.u32 %s247_s28, 4  ;;  %p1176_p9 = pneg %p1155_p5  ;;  %s1167_s8 = int_to_ptr.vmem [resolvable:$true] %s258_s8 }
  0x2e   : > { %s1164_s7 = scalar_lea.hbm %s1422_s1, %s1148_s14  ;;  %s790_s28 = scalar_lea.hbm %s1422_s1, 768 }
  0x2f   : > { %s785_s26 = scalar_lea.hbm %s1164_s7, 384  ;;  %p791_p12 = scmp.lt.u32.totalorder %s1164_s7, %s1422_s1 }
  0x30   : > { %p786_p6 = scmp.ne.s32.totalorder %s1164_s7, %s785_s26  ;;  %p792_p13 = scmp.lt.u32.totalorder %s790_s28, %s785_s26 }
  0x31   : > { %p794_p4 = scmp.lt.u32.totalorder %s785_s26, %s1164_s7 }
  0x32   : > { %p788_p10 = pnand %p1176_p9, %p786_p6  ;;  %p793_p0 = por %p792_p13, %p791_p12 }
  0x34   : > { %p789_p11 = pneg %p788_p10  ;;  %p795_p2 = por %p794_p4, %p793_p0 }
  0x36   : > { %p796_p7 = pnand %p795_p2, %p789_p11 }
  0x38   : > { %799 = shalt.err (!%p796_p7)
}
  0x39   : > { %s800_s27 = scalar_lea.vmem %s1167_s8, 384  ;;  %s1021_s30 = smov [#allocation6]  }
  0x3a   : > { %p801_p6 = scmp.ne.s32.totalorder %s1167_s8, %s800_s27  ;;  %s805_s6 = sshll.u32 %s1021_s30, 4  ;;  %s806_s6 = int_to_ptr.vmem [resolvable:$false] %s805_s6 }
  0x3b   : > { %s807_s20 = scalar_lea.vmem %s806_s6, 768  ;;  %p808_p1 = scmp.lt.s32.totalorder %s1167_s8, %s806_s6 }
  0x3c   : > { %p803_p10 = pnand %p801_p6, %p1176_p9  ;;  %p809_p8 = scmp.lt.s32.totalorder %s807_s20, %s800_s27 }
  0x3e   : > { %p804_p3 = pneg %p803_p10  ;;  %p810_p12 = por %p809_p8, %p808_p1 }
  0x40   : > { %p811_p13 = pnand %p810_p12, %p804_p3 }
  0x42   : > { %814 = shalt.err (!%p811_p13)
}
  0x43   : > { %s1404_s26 = smov 128   ;;  %s1406_s10 = smov 8  }
  0x44   : > { %698 = dma.hbm_to_vmem [thread:$0]  (!%p1155_p5), %s1164_s7, 384, %s1167_s8, %s1170_s29, %s1404_s26, %s1404_s26, %s1406_s10  }
  0x45   : > { %p316_p8 = scmp.lt.s32.totalorder %s1019_s23, 3  ;;  %p1424_p1 = scmp.ge.s32.totalorder %s1019_s23, 1 }
  0x46   : > { %s1426_s0 = sld [smem:[#allocation22_spill]]  ;;  %s222_s20 = scalar_lea.vmem [#allocation3], %s1151_s18 }
  0x47   : > { %p1206_p2 = pnand %p1424_p1, %p316_p8  ;;  %s233_s1 = sshll.u32 %s222_s20, 4  ;;  %s1217_s1 = int_to_ptr.vmem [resolvable:$true] %s233_s1 }
  0x48   : > { %s219_s7 = scalar_lea.sflag [#allocation4], %s1146_s13 }
  0x49   : > { %s1425_s28 = scalar_select %p1206_p2, 1, 0 }
  0x4c   : > { %s1214_s6 = scalar_lea.hbm %s1426_s0, %s1148_s14  ;;  %s820_s27 = scalar_lea.hbm %s1426_s0, 768 }
  0x4d   : > { %s815_s8 = scalar_lea.hbm %s1214_s6, 384  ;;  %p821_p0 = scmp.lt.u32.totalorder %s1214_s6, %s1426_s0 }
  0x4e   : > { %p816_p3 = scmp.ne.s32.totalorder %s1214_s6, %s815_s8  ;;  %p822_p4 = scmp.lt.u32.totalorder %s820_s27, %s815_s8 }
  0x4f   : > { %p824_p10 = scmp.lt.u32.totalorder %s815_s8, %s1214_s6 }
  0x50   : > { %p818_p7 = pnand %p816_p3, %p1176_p9  ;;  %p823_p6 = por %p822_p4, %p821_p0 }
  0x52   : > { %p819_p11 = pneg %p818_p7  ;;  %p825_p12 = por %p824_p10, %p823_p6 }
  0x54   : > { %p826_p13 = pnand %p825_p12, %p819_p11 }
  0x56   : > { %829 = shalt.err (!%p826_p13)
}
  0x57   : > { %s830_s20 = scalar_lea.vmem %s1217_s1, 384  ;;  %s1024_s26 = smov [#allocation3]  }
  0x58   : > { %p831_p8 = scmp.ne.s32.totalorder %s1217_s1, %s830_s20  ;;  %s835_s10 = sshll.u32 %s1024_s26, 4  ;;  %s836_s10 = int_to_ptr.vmem [resolvable:$false] %s835_s10 }
  0x59   : > { %s837_s9 = scalar_lea.vmem %s836_s10, 768  ;;  %p838_p7 = scmp.lt.s32.totalorder %s1217_s1, %s836_s10 }
  0x5a   : > { %p833_p1 = pnand %p831_p8, %p1176_p9  ;;  %p839_p2 = scmp.lt.s32.totalorder %s837_s9, %s830_s20 }
  0x5c   : > { %p834_p3 = pneg %p833_p1  ;;  %p840_p0 = por %p839_p2, %p838_p7 }
  0x5e   : > { %p841_p4 = pnand %p840_p0, %p834_p3 }
  0x60   : > { %844 = shalt.err (!%p841_p4)
}
  0x61   : > { %s1427_s8 = smov 8   ;;  %s1428_s27 = smov 128  }
  0x62   : > { %695 = dma.hbm_to_vmem [thread:$0]  (!%p1155_p5), %s1214_s6, 384, %s1217_s1, %s219_s7, %s1428_s27, %s1428_s27, %s1427_s8  }
  0x63   : > { %s1250_s20 = scalar_lea.hbm %s1396_s2, %s1148_s14  ;;  %s272_s10 = scalar_lea.vmem [#allocation8], %s1151_s18 }
  0x64   : > { %s283_s9 = sshll.u32 %s272_s10, 4  ;;  %s845_s0 = scalar_lea.hbm %s1250_s20, 384  ;;  %s1253_s9 = int_to_ptr.vmem [resolvable:$true] %s283_s9 }
  0x65   : > { %p846_p2 = scmp.ne.s32.totalorder %s1250_s20, %s845_s0  ;;  %s850_s6 = scalar_lea.hbm %s1396_s2, 768 }
  0x66   : > { %p851_p10 = scmp.lt.u32.totalorder %s1250_s20, %s1396_s2  ;;  %p852_p12 = scmp.lt.u32.totalorder %s850_s6, %s845_s0 }
  0x67   : > { %p848_p11 = pnand %p846_p2, %p1176_p9  ;;  %p854_p8 = scmp.lt.u32.totalorder %s845_s0, %s1250_s20 }
  0x68   : > { %p853_p13 = por %p852_p12, %p851_p10 }
  0x69   : > { %p849_p6 = pneg %p848_p11 }
  0x6a   : > { %p855_p1 = por %p854_p8, %p853_p13 }
  0x6c   : > { %p856_p3 = pnand %p855_p1, %p849_p6 }
  0x6e   : > { %859 = shalt.err (!%p856_p3)
}
  0x6f   : > { %s860_s26 = scalar_lea.vmem %s1253_s9, 384  ;;  %s1025_s17 = smov [#allocation8]  }
  0x70   : > { %p861_p7 = scmp.ne.s32.totalorder %s1253_s9, %s860_s26  ;;  %s865_s10 = sshll.u32 %s1025_s17, 4  ;;  %s866_s10 = int_to_ptr.vmem [resolvable:$false] %s865_s10 }
  0x71   : > { %s867_s1 = scalar_lea.vmem %s866_s10, 768  ;;  %p868_p2 = scmp.lt.s32.totalorder %s1253_s9, %s866_s10 }
  0x72   : > { %p863_p0 = pnand %p861_p7, %p1176_p9  ;;  %p869_p11 = scmp.lt.s32.totalorder %s867_s1, %s860_s26 }
  0x74   : > { %p864_p4 = pneg %p863_p0  ;;  %p870_p10 = por %p869_p11, %p868_p2 }
  0x76   : > { %p871_p12 = pnand %p870_p10, %p864_p4 }
  0x78   : > { %874 = shalt.err (!%p871_p12)
}
  0x79   : > { %701 = dma.hbm_to_vmem [thread:$0]  (!%p1155_p5), %s1250_s20, 384, %s1253_s9, %s1170_s29, %s1428_s27, %s1428_s27, %s1427_s8  }
  0x7a   : > { %s1284_s7 = scalar_lea.hbm %s1397_s3, %s1148_s14  ;;  %s297_s30 = scalar_lea.vmem [#allocation9], %s1151_s18 }
  0x7b   : > { %s308_s26 = sshll.u32 %s297_s30, 4  ;;  %s294_s17 = scalar_lea.sflag [#allocation10], %s1146_s13  ;;  %s1287_s26 = int_to_ptr.vmem [resolvable:$true] %s308_s26 }
  0x7c   : > { %s875_s10 = scalar_lea.hbm %s1284_s7, 384  ;;  %s880_s9 = scalar_lea.hbm %s1397_s3, 768 }
  0x7d   : > { %p876_p6 = scmp.ne.s32.totalorder %s1284_s7, %s875_s10  ;;  %p881_p1 = scmp.lt.u32.totalorder %s1284_s7, %s1397_s3 }
  0x7e   : > { %p882_p3 = scmp.lt.u32.totalorder %s880_s9, %s875_s10  ;;  %p884_p0 = scmp.lt.u32.totalorder %s875_s10, %s1284_s7 }
  0x7f   : > { %p878_p13 = pnand %p876_p6, %p1176_p9 }
  0x80   : > { %p883_p7 = por %p882_p3, %p881_p1 }
  0x81   : > { %p879_p8 = pneg %p878_p13 }
  0x82   : > { %p885_p4 = por %p884_p0, %p883_p7 }
  0x84   : > { %p886_p2 = pnand %p885_p4, %p879_p8 }
  0x86   : > { %889 = shalt.err (!%p886_p2)
}
  0x87   : > { %s890_s18 = scalar_lea.vmem %s1287_s26, 384  ;;  %s1026_s0 = smov [#allocation9]  }
  0x88   : > { %p891_p11 = scmp.ne.s32.totalorder %s1287_s26, %s890_s18  ;;  %s895_s6 = sshll.u32 %s1026_s0, 4  ;;  %s896_s6 = int_to_ptr.vmem [resolvable:$false] %s895_s6 }
  0x89   : > { %s897_s30 = scalar_lea.vmem %s896_s6, 768  ;;  %p898_p6 = scmp.lt.s32.totalorder %s1287_s26, %s896_s6 }
  0x8a   : > { %p893_p10 = pnand %p891_p11, %p1176_p9  ;;  %p899_p13 = scmp.lt.s32.totalorder %s897_s30, %s890_s18 }
  0x8c   : > { %p894_p12 = pneg %p893_p10  ;;  %p900_p1 = por %p899_p13, %p898_p6 }
  0x8e   : > { %p901_p3 = pnand %p900_p1, %p894_p12 }
  0x90   : > { %904 = shalt.err (!%p901_p3)
}
  0x91   : > { %704 = dma.hbm_to_vmem [thread:$0]  (!%p1155_p5), %s1284_s7, 384, %s1287_s26, %s294_s17, %s1428_s27, %s1428_s27, %s1427_s8  }
  0x92   : > { %p1429_p9 = scmp.ne.s32.totalorder %s1425_s28, 0 }
  0x93   : > { %s322_s22 = sand.u32 (!%p1429_p9), 1, %s1003_s19   ;;  %p1430_p8 = scmp.ne.s32.totalorder (!%p1429_p9), %s1416_s5, 0 }
  0x94   : > { %320 = sbr.rel (%p1429_p9) target bundleno = 403 (0x193), region = 36  ;;  %s323_s29 = scalar_lea.sflag (!%p1429_p9), [#allocation4], %s322_s22 }
  0x95   : > { %s679_s10 = smul.u32 (!%p1429_p9), 24, %s322_s22 }
  0x97   : > { %s326_s20 = scalar_lea.vmem (!%p1429_p9), [#allocation3], %s679_s10 }
  0x9b   : > { %970 = dma.done.wait (%p1430_p8), %s323_s29, 384  }
  0x9c   : > { %972 = vsyncadd (%p1430_p8), %s323_s29, 4294966912  ;;  %s331_s13 = sand.u32 1, %s1097_s24   ;;  %s335_s9 = scalar_lea.vmem [#allocation6], %s679_s10 }
  0x9d   : > { %s332_s25 = scalar_lea.sflag [#allocation7], %s331_s13 }
  0x9e   : > { %974 = dma.done.wait (%p1430_p8), %s332_s25, 768  }
  0x9f   : > { %976 = vsyncadd (%p1430_p8), %s332_s25, 4294966528  ;;  %s344_s28 = scalar_lea.vmem [#allocation8], %s679_s10  ;;  %s350_s8 = scalar_lea.sflag [#allocation10], %s322_s22 }
  0xa0   : > { %s353_s27 = scalar_lea.vmem [#allocation9], %s679_s10 }
  0xa1   : > { %978 = dma.done.wait (%p1430_p8), %s350_s8, 384  }
  0xa2   : > { %980 = vsyncadd (%p1430_p8), %s350_s8, 4294966912  ;;  %v420_v0 = vld [vmem:[%s326_s20] sm:$0xff]  ;;  %v421_v1 = vld [vmem:[%s326_s20 + $0x8] sm:$0xff]  ;;  %s390_s24 = sand.u32 1, %s991_s16   ;;  %s668_s17 = sshll.u32 %s1011_s21, 7 }
  0xa3   : > { %v422_v2 = vld [vmem:[%s326_s20 + $0x10] sm:$0xff]  ;;  %v424_v4 = vld [vmem:[%s335_s9 + $0x8] sm:$0xff]  ;;  %v425_v5 = vld [vmem:[%s335_s9 + $0x10] sm:$0xff]  ;;  %s663_s5 = sshll.u32 %s390_s24, 3  ;;  %s1339_s0 = scalar_lea.hbm %s1398_s4, %s668_s17 }
  0xa4   : > { %v423_v3 = vld [vmem:[%s335_s9] sm:$0xff]  ;;  %v429_v7 = vld [vmem:[%s344_s28] sm:$0xff]  ;;  %v430_v8 = vld [vmem:[%s344_s28 + $0x8] sm:$0xff]  ;;  %v427_v10 = vsub.f32 %v421_v1, %v424_v4  ;;  %v428_v11 = vsub.f32 %v422_v2, %v425_v5  ;;  %s392_s7 = scalar_lea.vmem [#allocation11], %s663_s5  ;;  %s497_s6 = scalar_lea.sflag [#allocation5], %s390_s24 }
  0xa5   : > { %v426_v6 = vsub.f32 %v420_v0, %v423_v3  ;;  %v431_v9 = vld [vmem:[%s344_s28 + $0x10] sm:$0xff]  ;;  %v433_v13 = vld [vmem:[%s353_s27 + $0x8] sm:$0xff]  ;;  %v434_v14 = vld [vmem:[%s353_s27 + $0x10] sm:$0xff]  ;;  %s510_s26 = sshll.u32 %s392_s7, 4  ;;  %p1431_p7 = scmp.ne.s32.totalorder %s1419_s11, 0  ;;  %s1334_s26 = int_to_ptr.vmem [resolvable:$true] %s510_s26 }
  0xa6   : > { %v432_v12 = vld [vmem:[%s353_s27] sm:$0xff]  ;;  %v436_v16 = vsub.f32 %v430_v8, %v433_v13  ;;  %v437_v17 = vsub.f32 %v431_v9, %v434_v14  ;;  %v457_v22 = vmul.f32 %v427_v10, %v427_v10  ;;  %v458_v23 = vmul.f32 %v428_v11, %v428_v11  ;;  %s905_s30 = scalar_lea.vmem %s1334_s26, 128  ;;  %s1027_s21 = smov [#allocation11]  }
  0xa7   : > { %v435_v15 = vsub.f32 %v429_v7, %v432_v12  ;;  %v456_v18 = vmul.f32 %v426_v6, %v426_v6  ;;  %p906_p5 = scmp.ne.s32.totalorder %s1334_s26, %s905_s30  ;;  %s909_s22 = sshll.u32 %s1027_s21, 4  ;;  %s910_s22 = int_to_ptr.vmem [resolvable:$false] %s909_s22 }
  0xa8   : > { %v439_v20 = vand.u32 2147483647, %v436_v16  ;;  %v440_v21 = vand.u32 2147483647, %v437_v17  ;;  %v460_v34 = vmul.f32 0.0013020834, %v457_v22  ;;  %p912_p2 = scmp.lt.s32.totalorder %s1334_s26, %s910_s22 }
  0xa9   : > { %v438_v19 = vand.u32 2147483647, %v435_v15  ;;  %v459_v24 = vmul.f32 0.0013020834, %v456_v18  ;;  %v461_v35 = vmul.f32 0.0013020834, %v458_v23  ;;  %p907_p0 = pnand %p906_p5, %p1431_p7 }
  0xaa   : > { %v442_v26 = vmul.f32 %v439_v20, %v439_v20  ;;  %v443_v27 = vmul.f32 %v440_v21, %v440_v21  ;;  %v665_v29 = vadd.f32 -0.05, %v439_v20  ;;  %v666_v30 = vadd.f32 -0.05, %v440_v21  ;;  %s911_s10 = scalar_lea.vmem %s910_s22, 256 }
  0xab   : > { %v441_v25 = vmul.f32 %v438_v19, %v438_v19  ;;  %v664_v28 = vadd.f32 -0.05, %v438_v19  ;;  %vm450_vm0 = vcmp.gt.f32.partialorder %v438_v19, 0.1  ;;  %vm451_vm1 = vcmp.gt.f32.partialorder %v439_v20, 0.1  ;;  %p908_p4 = pneg %p907_p0  ;;  %p913_p11 = scmp.lt.s32.totalorder %s911_s10, %s905_s30 }
  0xac   : > { %v445_v32 = vmul.f32 5.0, %v442_v26  ;;  %v446_v33 = vmul.f32 5.0, %v443_v27  ;;  %vm452_vm2 = vcmp.gt.f32.partialorder %v440_v21, 0.1 }
  0xad   : > { %v444_v31 = vmul.f32 5.0, %v441_v25  ;;  %p914_p10 = por %p913_p11, %p912_p2 }
  0xae   : > { %v454_v37 = vsel %vm451_vm1, %v665_v29, %v445_v32  ;;  %v455_v38 = vsel %vm452_vm2, %v666_v30, %v446_v33 }
  0xaf   : > { %v453_v36 = vsel %vm450_vm0, %v664_v28, %v444_v31  ;;  %v463_v40 = vmul.f32 0.00390625, %v454_v37  ;;  %v464_v41 = vmul.f32 0.00390625, %v455_v38  ;;  %p915_p12 = pnand %p914_p10, %p908_p4 }
  0xb0   : > { %v462_v39 = vmul.f32 0.00390625, %v453_v36 }
  0xb1   : > { %v466_v43 = vadd.f32 %v463_v40, %v460_v34  ;;  %v467_v44 = vadd.f32 %v464_v41, %v461_v35 }
  0xb2   : > { %v465_v42 = vadd.f32 %v462_v39, %v459_v24 }
  0xb4   : > { %v483_v45 = vadd.f32 %v466_v43, %v465_v42 }
  0xb6   : > { %v484_v46 = vadd.f32 %v483_v45, %v467_v44 }
  0xb8   : > { %485 = vadd.xlane.f32.xlu0 %v484_v46 }
 0x145   : > { %v486_v47 = vpop.xlane.xlu0 %485 }
 0x146   : > { %v487_v48 = vrot.slane %v486_v47, 4 }
 0x148   : > { %v488_v49 = vadd.f32 %v487_v48, %v486_v47 }
 0x14a   : > { %v489_v50 = vrot.slane %v488_v49, 2 }
 0x14c   : > { %v490_v51 = vadd.f32 %v489_v50, %v488_v49 }
 0x14e   : > { %v491_v52 = vrot.slane %v490_v51, 1 }
 0x150   : > { %v492_v53 = vadd.f32 %v491_v52, %v490_v51 }
 0x152   : > { %680 = vpush %v492_v53 }
 0x183   : > { %s681_s14 = spop %680 }
 0x184   : > { %v494_v54 = vstv %s681_s14 }
 0x185   : > { %495 = vst [vmem:[%s392_s7] sm:$0xff] %v494_v54 }
 0x186   : > { %918 = shalt.err (!%p915_p12)
}
 0x187   : > { %s919_s29 = scalar_lea.hbm %s1339_s0, 128  ;;  %s923_s25 = scalar_lea.hbm %s1398_s4, 256 }
 0x188   : > { %p920_p6 = scmp.ne.s32.totalorder %s1339_s0, %s919_s29  ;;  %p924_p3 = scmp.lt.u32.totalorder %s1339_s0, %s1398_s4 }
 0x189   : > { %p925_p9 = scmp.lt.u32.totalorder %s923_s25, %s919_s29  ;;  %p927_p5 = scmp.lt.u32.totalorder %s919_s29, %s1339_s0 }
 0x18a   : > { %p921_p13 = pnand %p920_p6, %p1431_p7 }
 0x18b   : > { %p926_p8 = por %p925_p9, %p924_p3 }
 0x18c   : > { %p922_p1 = pneg %p921_p13 }
 0x18d   : > { %p928_p0 = por %p927_p5, %p926_p8 }
 0x18f   : > { %p929_p4 = pnand %p928_p0, %p922_p1 }
 0x191   : > { %932 = shalt.err (!%p929_p4)
}
 0x192   : > { %690 = dma.vmem_to_hbm [thread:$0]  (%p1431_p7), %s1334_s26, 128, %s1339_s0, %s497_s6  }
 0x193 PF: > { %s522_s8 = sand.u32 1, %s987_s15   ;;  %p1432_p2 = scmp.ne.s32.totalorder %s1420_s12, 0 }
 0x194   : > { %p1433_p11 = scmp.ge.s32.totalorder %s1019_s23, 2  ;;  %s523_s27 = scalar_lea.sflag [#allocation5], %s522_s8 }
 0x196   : > { %p706_p10 = pnand %p1433_p11, %p1432_p2 }
 0x198   : > { %982 = dma.done.wait (!%p706_p10), %s523_s27, 128  }
 0x199   : > { %984 = vsyncadd (!%p706_p10), %s523_s27, 4294967168  ;;  %s26_s23 = sadd.s32 1, %s1019_s23   ;;  %s1434_s24 = sld [smem:[#allocation16_spill]] }
 0x19a   : > { %p23_p12 = scmp.ge.s32.totalorder %s26_s23, 4   ;;  %s1435_s17 = sld [smem:[#allocation20_spill]] }
 0x19b   : > { %s1436_s11 = sld [smem:[#allocation17_spill]]  ;;  %s1437_s20 = sld [smem:[#allocation21_spill]] }
 0x19c   : > { %s1438_s21 = sld [smem:[#allocation18_spill]]  ;;  %s1439_s22 = sld [smem:[#allocation19_spill]] }
 0x19d   : > { %s1440_s15 = smov %s991_s16  ;;  %s1442_s18 = smov %s1003_s19 }
 0x19e   :  { %25 = sbr.rel (!%p23_p12) target bundleno = 15 (0xf), region = 126 }
 0x19f   : > { %s1441_s16 = smov %s1434_s24 }
 0x1a1   : > { %s1443_s19 = smov %s1436_s11 }
 0x1a5   :  { %528 = vsyncpa [#allocation4], 1 }
 0x1a6   :  { %530 = vsyncpa [#allocation4 + $0x1], 1 }
 0x1a7   :  { %531 = vsyncpa [#allocation7], 1 }
 0x1a8   :  { %533 = vsyncpa [#allocation7 + $0x1], 1 }
 0x1a9   :  { %534 = vsyncpa [#allocation10], 1 }
 0x1aa   :  { %536 = vsyncpa [#allocation10 + $0x1], 1 }
 0x1ab   :  { %537 = vsyncpa [#allocation5], 1 }
 0x1ac   :  { %539 = vsyncpa [#allocation5 + $0x1], 1 }

</bundles_post_ra>
